<compile_context>
chip_gen: v5e
topology: v5e:2x2
jax: 0.10.0
libtpu: 0.0.40
codegen_flags: <defaults>
</compile_context>

<pallas_src>
import jax
import jax.numpy as jnp
import numpy as np
from jax.experimental import pallas as pl
from jax.experimental.pallas import tpu as pltpu


# ---------------------------------------------------------------------------
# Fused Pallas kernel (whole network, one batch element per grid step)
# ---------------------------------------------------------------------------
def _make_fused_kernel(cfg):
    """cfg: list of per-block dicts {K, d, ch, has_down} (static)."""

    def kernel(*refs):
        it = iter(refs)
        x_ref = next(it)                      # (1, Cin, L)
        h = x_ref[0].astype(jnp.float32)      # (Cin, L) channels-first
        L = h.shape[1]

        def shift_right(v, off):
            # causal time shift: out[:, t] = v[:, t-off], zeros for t < off
            if off == 0:
                return v
            c = v.shape[0]
            if off >= L:                      # entire window is left padding
                return jnp.zeros((c, L), jnp.float32)
            return jnp.concatenate(
                [jnp.zeros((c, off), jnp.float32), v[:, :L - off]], axis=1)

        for blk in cfg:
            K, d, has_down = blk["K"], blk["d"], blk["has_down"]
            w1_ref = next(it)                 # (Ch, K*Cin)
            w2_ref = next(it)                 # (Ch, K*Ch)
            b_ref = next(it)                  # (Ch, 2 or 3)
            wd_ref = next(it) if has_down else None

            b_all = b_ref[...].astype(jnp.float32)
            b1 = b_all[:, 0:1]
            b2 = b_all[:, 1:2]

            def causal_conv(hin, w_ref, bias):
                # im2col over the K dilated taps -> one MXU matmul
                slab = jnp.concatenate(
                    [shift_right(hin, (K - 1 - k) * d) for k in range(K)],
                    axis=0) if K > 1 else hin            # (K*Cin, L)
                return jnp.dot(w_ref[...].astype(jnp.float32), slab,
                               preferred_element_type=jnp.float32) + bias

            # conv1 + chomp + relu (dropout = identity at inference)
            h1 = jnp.maximum(causal_conv(h, w1_ref, b1), 0.0)
            # conv2 + chomp + relu
            h2 = jnp.maximum(causal_conv(h1, w2_ref, b2), 0.0)
            # residual (1x1 downsample conv when Cin != Cout) + final relu
            if has_down:
                bd = b_all[:, 2:3]
                res = jnp.dot(wd_ref[...].astype(jnp.float32), h,
                              preferred_element_type=jnp.float32) + bd
            else:
                res = h
            h = jnp.maximum(h2 + res, 0.0)

        # ---- Linear head + sigmoid, lane-dense (time on lanes) ----
        wl_ref = next(it)                     # (1, C_last)
        bl_ref = next(it)                     # (1, 1)
        out_ref = next(it)                    # (1, 1, L)
        o = jnp.dot(wl_ref[...].astype(jnp.float32), h,
                    preferred_element_type=jnp.float32)  # (1, L)
        o = o + bl_ref[...].astype(jnp.float32)
        out_ref[0] = jax.nn.sigmoid(o).astype(out_ref.dtype)

    return kernel


# ---------------------------------------------------------------------------
# Wrapper: prepares kernel-ready weight slabs and launches one fused call
# ---------------------------------------------------------------------------
def tcn_forward(inputs_ncl, params, kernel_size, dilation_size):
    """inputs_ncl: (N, C_in, L) like PyTorch.  Returns (N, L) = sigmoid(linear(tcn(x)))."""
    N, cin, L = inputs_ncl.shape
    K = kernel_size

    cfg = []
    args = [inputs_ncl]
    in_specs = [pl.BlockSpec((1, cin, L), lambda n: (n, 0, 0))]

    for i, p in enumerate(params["blocks"]):
        d = dilation_size ** i
        ch = p["w1"].shape[0]                 # torch conv weight: (Cout, Cin, K)
        has_down = "wd" in p

        # flatten taps: column index = k*Cin + ci  <->  torch_w[co, ci, k]
        w1f = jnp.transpose(p["w1"], (0, 2, 1)).reshape(ch, K * cin)
        w2f = jnp.transpose(p["w2"], (0, 2, 1)).reshape(ch, K * ch)
        bias_cols = [p["b1"].reshape(ch, 1), p["b2"].reshape(ch, 1)]
        if has_down:
            bias_cols.append(p["bd"].reshape(ch, 1))
        b_all = jnp.concatenate(bias_cols, axis=1)

        args += [w1f, w2f, b_all]
        in_specs += [pl.BlockSpec(w1f.shape, lambda n: (0, 0)),
                     pl.BlockSpec(w2f.shape, lambda n: (0, 0)),
                     pl.BlockSpec(b_all.shape, lambda n: (0, 0))]
        if has_down:
            args.append(p["wd"])              # (Ch, Cin)
            in_specs.append(pl.BlockSpec(p["wd"].shape, lambda n: (0, 0)))

        cfg.append(dict(K=K, d=d, ch=ch, has_down=has_down))
        cin = ch

    w_head = params["w_lin"]                  # (1, C_last)  (torch Linear weight)
    b_head = params["b_lin"].reshape(1, 1)
    args += [w_head, b_head]
    in_specs += [pl.BlockSpec(w_head.shape, lambda n: (0, 0)),
                 pl.BlockSpec(b_head.shape, lambda n: (0, 0))]

    out = pl.pallas_call(
        _make_fused_kernel(cfg),
        out_shape=jax.ShapeDtypeStruct((N, 1, L), inputs_ncl.dtype),
        grid=(N,),
        in_specs=in_specs,
        out_specs=pl.BlockSpec((1, 1, L), lambda n: (n, 0, 0)),
        compiler_params=pltpu.CompilerParams(dimension_semantics=("parallel",)),
    )(*args)
    return out[:, 0, :]                       # (N, L), torch .squeeze(dim=-1)


# ---------------------------------------------------------------------------
# Deterministic parameter init (PyTorch-shaped tensors)
# ---------------------------------------------------------------------------
def init_params(key, input_size, output_size, num_channels, kernel_size):
    params = {"blocks": []}
    in_ch = input_size
    for out_ch in num_channels:
        key, k1, k2, k3, k4, k5, k6 = jax.random.split(key, 7)
        blk = {
            "w1": 0.3 * jax.random.normal(k1, (out_ch, in_ch, kernel_size), jnp.float32),
            "b1": 0.1 * jax.random.normal(k2, (out_ch,), jnp.float32),
            "w2": 0.3 * jax.random.normal(k3, (out_ch, out_ch, kernel_size), jnp.float32),
            "b2": 0.1 * jax.random.normal(k4, (out_ch,), jnp.float32),
        }
        if in_ch != out_ch:                   # downsample = Conv1d(in_ch, out_ch, 1)
            blk["wd"] = 0.3 * jax.random.normal(k5, (out_ch, in_ch), jnp.float32)
            blk["bd"] = 0.1 * jax.random.normal(k6, (out_ch,), jnp.float32)
        params["blocks"].append(blk)
        in_ch = out_ch

    key, k1, k2 = jax.random.split(key, 3)
    params["w_lin"] = 0.3 * jax.random.normal(k1, (output_size, num_channels[-1]), jnp.float32)
    params["b_lin"] = 0.1 * jax.random.normal(k2, (output_size,), jnp.float32)
    return params


# ---------------------------------------------------------------------------
# Pure-JAX reference (PyTorch semantics, for numerical check)
# ---------------------------------------------------------------------------
def ref_forward(inputs_ncl, params, kernel_size, dilation_size):
    x = inputs_ncl.astype(jnp.float32)
    K = kernel_size
    for i, p in enumerate(params["blocks"]):
        d = dilation_size ** i
        pad = (K - 1) * d

        def conv(h, w, b):
            hp = jnp.pad(h, ((0, 0), (0, 0), (pad, 0)))
            out = jnp.zeros((h.shape[0], w.shape[0], h.shape[2]), jnp.float32)
            for k in range(K):
                out = out + jnp.einsum("ncl,oc->nol",
                                       hp[:, :, k * d:k * d + h.shape[2]], w[:, :, k])
            return out + b[None, :, None]

        h1 = jax.nn.relu(conv(x, p["w1"], p["b1"]))
        h2 = jax.nn.relu(conv(h1, p["w2"], p["b2"]))
        if "wd" in p:
            res = jnp.einsum("ncl,oc->nol", x, p["wd"]) + p["bd"][None, :, None]
        else:
            res = x
        x = jax.nn.relu(h2 + res)
    o = jnp.einsum("ncl,oc->nlo", x, params["w_lin"]) + params["b_lin"][None, None, :]
    return jax.nn.sigmoid(o[..., 0])


# ---------------------------------------------------------------------------
if __name__ == "__main__":
    # TCN(input_size=4, output_size=1, num_channels=[8, 8], kernel_size=2,
    #     dropout=0.0, dilation_size=2)
    input_size = 4
    output_size = 1          # .squeeze(dim=-1) in forward implies output_size == 1
    num_channels = [8, 8]
    kernel_size = 2
    dilation_size = 2
    N, L = 2, 16

    key = jax.random.PRNGKey(0)
    kp, kx = jax.random.split(key)
    params = init_params(kp, input_size, output_size, num_channels, kernel_size)
    inputs = jax.random.normal(kx, (N, input_size, L), jnp.float32)   # (N, C_in, L_in)

    out = tcn_forward(inputs, params, kernel_size, dilation_size)
    out = jax.block_until_ready(out)

    ref = ref_forward(inputs, params, kernel_size, dilation_size)
    np.testing.assert_allclose(np.asarray(out), np.asarray(ref), rtol=1e-5, atol=1e-5)
    assert out.shape == (N, L)

    print("KERNEL_OK")
</pallas_src>

<mosaic_0001>
module attributes {stable_mosaic.version = 11 : i64} {
  func.func @kernel(%arg0: i32, %arg1: memref<1x4x16xf32, #tpu.memory_space<vmem>>, %arg2: memref<8x8xf32, #tpu.memory_space<vmem>>, %arg3: memref<8x16xf32, #tpu.memory_space<vmem>>, %arg4: memref<8x3xf32, #tpu.memory_space<vmem>>, %arg5: memref<8x4xf32, #tpu.memory_space<vmem>>, %arg6: memref<8x16xf32, #tpu.memory_space<vmem>>, %arg7: memref<8x16xf32, #tpu.memory_space<vmem>>, %arg8: memref<8x2xf32, #tpu.memory_space<vmem>>, %arg9: memref<1x8xf32, #tpu.memory_space<vmem>>, %arg10: memref<1x1xf32, #tpu.memory_space<vmem>>, %arg11: memref<1x1x16xf32, #tpu.memory_space<vmem>>) attributes {dimension_semantics = [#tpu.dimension_semantics<parallel>], iteration_bounds = array<i64: 2>, scalar_prefetch = 0 : i64, scratch_operands = 0 : i64, tpu.core_type = #tpu.core_type<tc>, window_params = [{transform_indices = @transform_0, window_bounds = array<i64: 1, 4, 16>}, {pipeline_mode = #tpu.pipeline_mode<synchronous>, transform_indices = @transform_1, window_bounds = array<i64: 8, 8>}, {pipeline_mode = #tpu.pipeline_mode<synchronous>, transform_indices = @transform_2, window_bounds = array<i64: 8, 16>}, {pipeline_mode = #tpu.pipeline_mode<synchronous>, transform_indices = @transform_3, window_bounds = array<i64: 8, 3>}, {pipeline_mode = #tpu.pipeline_mode<synchronous>, transform_indices = @transform_4, window_bounds = array<i64: 8, 4>}, {pipeline_mode = #tpu.pipeline_mode<synchronous>, transform_indices = @transform_5, window_bounds = array<i64: 8, 16>}, {pipeline_mode = #tpu.pipeline_mode<synchronous>, transform_indices = @transform_6, window_bounds = array<i64: 8, 16>}, {pipeline_mode = #tpu.pipeline_mode<synchronous>, transform_indices = @transform_7, window_bounds = array<i64: 8, 2>}, {pipeline_mode = #tpu.pipeline_mode<synchronous>, transform_indices = @transform_8, window_bounds = array<i64: 1, 8>}, {pipeline_mode = #tpu.pipeline_mode<synchronous>, transform_indices = @transform_9, window_bounds = array<i64: 1, 1>}, {transform_indices = @transform_10, window_bounds = array<i64: 1, 1, 16>}]} {
    %c0 = arith.constant 0 : index
    %c0_0 = arith.constant 0 : index
    %c0_1 = arith.constant 0 : index
    %0 = vector.load %arg1[%c0, %c0_0, %c0_1] : memref<1x4x16xf32, #tpu.memory_space<vmem>>, vector<1x4x16xf32>
    %1 = vector.shape_cast %0 : vector<1x4x16xf32> to vector<4x16xf32>
    %c0_2 = arith.constant 0 : index
    %c0_3 = arith.constant 0 : index
    %2 = vector.load %arg4[%c0_2, %c0_3] : memref<8x3xf32, #tpu.memory_space<vmem>>, vector<8x3xf32>
    %3 = vector.extract_strided_slice %2 {offsets = [0, 0], sizes = [8, 1], strides = [1, 1]} : vector<8x3xf32> to vector<8x1xf32>
    %4 = vector.extract_strided_slice %2 {offsets = [0, 1], sizes = [8, 1], strides = [1, 1]} : vector<8x3xf32> to vector<8x1xf32>
    %cst = arith.constant 0.000000e+00 : f32
    %5 = vector.broadcast %cst : f32 to vector<4x1xf32>
    %6 = vector.extract_strided_slice %1 {offsets = [0, 0], sizes = [4, 15], strides = [1, 1]} : vector<4x16xf32> to vector<4x15xf32>
    %7 = tpu.concatenate %5, %6 in 1 : vector<4x1xf32>, vector<4x15xf32> -> vector<4x16xf32>
    %8 = tpu.concatenate %7, %1 in 0 : vector<4x16xf32>, vector<4x16xf32> -> vector<8x16xf32>
    %c0_4 = arith.constant 0 : index
    %c0_5 = arith.constant 0 : index
    %9 = vector.load %arg2[%c0_4, %c0_5] : memref<8x8xf32, #tpu.memory_space<vmem>>, vector<8x8xf32>
    %cst_6 = arith.constant dense<0.000000e+00> : vector<8x16xf32>
    %10 = tpu.matmul %9, %8, %cst_6 {dimension_numbers = #tpu.dot_dimension_numbers<[1], [0], [0], [1], [0, 0, 1, 1], [], []>} : vector<8x8xf32>, vector<8x16xf32>, vector<8x16xf32> -> vector<8x16xf32>
    %11 = vector.broadcast %3 : vector<8x1xf32> to vector<8x16xf32>
    %12 = arith.addf %10, %11 : vector<8x16xf32>
    %cst_7 = arith.constant 0.000000e+00 : f32
    %13 = vector.broadcast %cst_7 : f32 to vector<8x16xf32>
    %14 = arith.maximumf %12, %13 : vector<8x16xf32>
    %cst_8 = arith.constant 0.000000e+00 : f32
    %15 = vector.broadcast %cst_8 : f32 to vector<8x1xf32>
    %16 = vector.extract_strided_slice %14 {offsets = [0, 0], sizes = [8, 15], strides = [1, 1]} : vector<8x16xf32> to vector<8x15xf32>
    %17 = tpu.concatenate %15, %16 in 1 : vector<8x1xf32>, vector<8x15xf32> -> vector<8x16xf32>
    %18 = tpu.concatenate %17, %14 in 0 : vector<8x16xf32>, vector<8x16xf32> -> vector<16x16xf32>
    %c0_9 = arith.constant 0 : index
    %c0_10 = arith.constant 0 : index
    %19 = vector.load %arg3[%c0_9, %c0_10] : memref<8x16xf32, #tpu.memory_space<vmem>>, vector<8x16xf32>
    %cst_11 = arith.constant dense<0.000000e+00> : vector<8x16xf32>
    %20 = tpu.matmul %19, %18, %cst_11 {dimension_numbers = #tpu.dot_dimension_numbers<[1], [0], [0], [1], [0, 0, 1, 1], [], []>} : vector<8x16xf32>, vector<16x16xf32>, vector<8x16xf32> -> vector<8x16xf32>
    %21 = vector.broadcast %4 : vector<8x1xf32> to vector<8x16xf32>
    %22 = arith.addf %20, %21 : vector<8x16xf32>
    %cst_12 = arith.constant 0.000000e+00 : f32
    %23 = vector.broadcast %cst_12 : f32 to vector<8x16xf32>
    %24 = arith.maximumf %22, %23 : vector<8x16xf32>
    %25 = vector.extract_strided_slice %2 {offsets = [0, 2], sizes = [8, 1], strides = [1, 1]} : vector<8x3xf32> to vector<8x1xf32>
    %c0_13 = arith.constant 0 : index
    %c0_14 = arith.constant 0 : index
    %26 = vector.load %arg5[%c0_13, %c0_14] : memref<8x4xf32, #tpu.memory_space<vmem>>, vector<8x4xf32>
    %cst_15 = arith.constant dense<0.000000e+00> : vector<8x16xf32>
    %27 = tpu.matmul %26, %1, %cst_15 {dimension_numbers = #tpu.dot_dimension_numbers<[1], [0], [0], [1], [0, 0, 1, 1], [], []>} : vector<8x4xf32>, vector<4x16xf32>, vector<8x16xf32> -> vector<8x16xf32>
    %28 = vector.broadcast %25 : vector<8x1xf32> to vector<8x16xf32>
    %29 = arith.addf %27, %28 : vector<8x16xf32>
    %30 = arith.addf %24, %29 : vector<8x16xf32>
    %cst_16 = arith.constant 0.000000e+00 : f32
    %31 = vector.broadcast %cst_16 : f32 to vector<8x16xf32>
    %32 = arith.maximumf %30, %31 : vector<8x16xf32>
    %c0_17 = arith.constant 0 : index
    %c0_18 = arith.constant 0 : index
    %33 = vector.load %arg8[%c0_17, %c0_18] : memref<8x2xf32, #tpu.memory_space<vmem>>, vector<8x2xf32>
    %34 = vector.extract_strided_slice %33 {offsets = [0, 0], sizes = [8, 1], strides = [1, 1]} : vector<8x2xf32> to vector<8x1xf32>
    %35 = vector.extract_strided_slice %33 {offsets = [0, 1], sizes = [8, 1], strides = [1, 1]} : vector<8x2xf32> to vector<8x1xf32>
    %cst_19 = arith.constant 0.000000e+00 : f32
    %36 = vector.broadcast %cst_19 : f32 to vector<8x2xf32>
    %37 = vector.extract_strided_slice %32 {offsets = [0, 0], sizes = [8, 14], strides = [1, 1]} : vector<8x16xf32> to vector<8x14xf32>
    %38 = tpu.concatenate %36, %37 in 1 : vector<8x2xf32>, vector<8x14xf32> -> vector<8x16xf32>
    %39 = tpu.concatenate %38, %32 in 0 : vector<8x16xf32>, vector<8x16xf32> -> vector<16x16xf32>
    %c0_20 = arith.constant 0 : index
    %c0_21 = arith.constant 0 : index
    %40 = vector.load %arg6[%c0_20, %c0_21] : memref<8x16xf32, #tpu.memory_space<vmem>>, vector<8x16xf32>
    %cst_22 = arith.constant dense<0.000000e+00> : vector<8x16xf32>
    %41 = tpu.matmul %40, %39, %cst_22 {dimension_numbers = #tpu.dot_dimension_numbers<[1], [0], [0], [1], [0, 0, 1, 1], [], []>} : vector<8x16xf32>, vector<16x16xf32>, vector<8x16xf32> -> vector<8x16xf32>
    %42 = vector.broadcast %34 : vector<8x1xf32> to vector<8x16xf32>
    %43 = arith.addf %41, %42 : vector<8x16xf32>
    %cst_23 = arith.constant 0.000000e+00 : f32
    %44 = vector.broadcast %cst_23 : f32 to vector<8x16xf32>
    %45 = arith.maximumf %43, %44 : vector<8x16xf32>
    %cst_24 = arith.constant 0.000000e+00 : f32
    %46 = vector.broadcast %cst_24 : f32 to vector<8x2xf32>
    %47 = vector.extract_strided_slice %45 {offsets = [0, 0], sizes = [8, 14], strides = [1, 1]} : vector<8x16xf32> to vector<8x14xf32>
    %48 = tpu.concatenate %46, %47 in 1 : vector<8x2xf32>, vector<8x14xf32> -> vector<8x16xf32>
    %49 = tpu.concatenate %48, %45 in 0 : vector<8x16xf32>, vector<8x16xf32> -> vector<16x16xf32>
    %c0_25 = arith.constant 0 : index
    %c0_26 = arith.constant 0 : index
    %50 = vector.load %arg7[%c0_25, %c0_26] : memref<8x16xf32, #tpu.memory_space<vmem>>, vector<8x16xf32>
    %cst_27 = arith.constant dense<0.000000e+00> : vector<8x16xf32>
    %51 = tpu.matmul %50, %49, %cst_27 {dimension_numbers = #tpu.dot_dimension_numbers<[1], [0], [0], [1], [0, 0, 1, 1], [], []>} : vector<8x16xf32>, vector<16x16xf32>, vector<8x16xf32> -> vector<8x16xf32>
    %52 = vector.broadcast %35 : vector<8x1xf32> to vector<8x16xf32>
    %53 = arith.addf %51, %52 : vector<8x16xf32>
    %cst_28 = arith.constant 0.000000e+00 : f32
    %54 = vector.broadcast %cst_28 : f32 to vector<8x16xf32>
    %55 = arith.maximumf %53, %54 : vector<8x16xf32>
    %56 = arith.addf %55, %32 : vector<8x16xf32>
    %cst_29 = arith.constant 0.000000e+00 : f32
    %57 = vector.broadcast %cst_29 : f32 to vector<8x16xf32>
    %58 = arith.maximumf %56, %57 : vector<8x16xf32>
    %c0_30 = arith.constant 0 : index
    %c0_31 = arith.constant 0 : index
    %59 = vector.load %arg9[%c0_30, %c0_31] : memref<1x8xf32, #tpu.memory_space<vmem>>, vector<1x8xf32>
    %cst_32 = arith.constant dense<0.000000e+00> : vector<1x16xf32>
    %60 = tpu.matmul %59, %58, %cst_32 {dimension_numbers = #tpu.dot_dimension_numbers<[1], [0], [0], [1], [0, 0, 1, 1], [], []>} : vector<1x8xf32>, vector<8x16xf32>, vector<1x16xf32> -> vector<1x16xf32>
    %c0_33 = arith.constant 0 : index
    %c0_34 = arith.constant 0 : index
    %61 = vector.load %arg10[%c0_33, %c0_34] : memref<1x1xf32, #tpu.memory_space<vmem>>, vector<1x1xf32>
    %62 = vector.broadcast %61 : vector<1x1xf32> to vector<1x16xf32>
    %63 = arith.addf %60, %62 : vector<1x16xf32>
    %64 = arith.negf %63 : vector<1x16xf32>
    %65 = math.exp %64 : vector<1x16xf32>
    %cst_35 = arith.constant 1.000000e+00 : f32
    %66 = vector.broadcast %cst_35 : f32 to vector<1x16xf32>
    %67 = arith.addf %66, %65 : vector<1x16xf32>
    %68 = arith.divf %66, %67 : vector<1x16xf32>
    %c0_36 = arith.constant 0 : index
    %c0_37 = arith.constant 0 : index
    %c0_38 = arith.constant 0 : index
    %69 = vector.load %arg11[%c0_36, %c0_37, %c0_38] : memref<1x1x16xf32, #tpu.memory_space<vmem>>, vector<1x1x16xf32>
    %70 = vector.shape_cast %69 : vector<1x1x16xf32> to vector<1x16xf32>
    %71 = vector.shape_cast %68 : vector<1x16xf32> to vector<1x1x16xf32>
    tpu.vector_store %arg11[%c0_36, %c0_37, %c0_38], %71 {strides = array<i32>} : memref<1x1x16xf32, #tpu.memory_space<vmem>>, vector<1x1x16xf32>,
    return
  }
  func.func @transform_0(%arg0: i32) -> (i32, i32, i32) {
    %c0_i32 = arith.constant 0 : i32
    %c0_i32_0 = arith.constant 0 : i32
    %c0_i32_1 = arith.constant 0 : i32
    return %arg0, %c0_i32, %c0_i32_0 : i32, i32, i32
  }
  func.func @transform_1(%arg0: i32) -> (i32, i32) {
    %c0_i32 = arith.constant 0 : i32
    %c0_i32_0 = arith.constant 0 : i32
    %c0_i32_1 = arith.constant 0 : i32
    return %c0_i32, %c0_i32_0 : i32, i32
  }
  func.func @transform_2(%arg0: i32) -> (i32, i32) {
    %c0_i32 = arith.constant 0 : i32
    %c0_i32_0 = arith.constant 0 : i32
    %c0_i32_1 = arith.constant 0 : i32
    return %c0_i32, %c0_i32_0 : i32, i32
  }
  func.func @transform_3(%arg0: i32) -> (i32, i32) {
    %c0_i32 = arith.constant 0 : i32
    %c0_i32_0 = arith.constant 0 : i32
    %c0_i32_1 = arith.constant 0 : i32
    return %c0_i32, %c0_i32_0 : i32, i32
  }
  func.func @transform_4(%arg0: i32) -> (i32, i32) {
    %c0_i32 = arith.constant 0 : i32
    %c0_i32_0 = arith.constant 0 : i32
    %c0_i32_1 = arith.constant 0 : i32
    return %c0_i32, %c0_i32_0 : i32, i32
  }
  func.func @transform_5(%arg0: i32) -> (i32, i32) {
    %c0_i32 = arith.constant 0 : i32
    %c0_i32_0 = arith.constant 0 : i32
    %c0_i32_1 = arith.constant 0 : i32
    return %c0_i32, %c0_i32_0 : i32, i32
  }
  func.func @transform_6(%arg0: i32) -> (i32, i32) {
    %c0_i32 = arith.constant 0 : i32
    %c0_i32_0 = arith.constant 0 : i32
    %c0_i32_1 = arith.constant 0 : i32
    return %c0_i32, %c0_i32_0 : i32, i32
  }
  func.func @transform_7(%arg0: i32) -> (i32, i32) {
    %c0_i32 = arith.constant 0 : i32
    %c0_i32_0 = arith.constant 0 : i32
    %c0_i32_1 = arith.constant 0 : i32
    return %c0_i32, %c0_i32_0 : i32, i32
  }
  func.func @transform_8(%arg0: i32) -> (i32, i32) {
    %c0_i32 = arith.constant 0 : i32
    %c0_i32_0 = arith.constant 0 : i32
    %c0_i32_1 = arith.constant 0 : i32
    return %c0_i32, %c0_i32_0 : i32, i32
  }
  func.func @transform_9(%arg0: i32) -> (i32, i32) {
    %c0_i32 = arith.constant 0 : i32
    %c0_i32_0 = arith.constant 0 : i32
    %c0_i32_1 = arith.constant 0 : i32
    return %c0_i32, %c0_i32_0 : i32, i32
  }
  func.func @transform_10(%arg0: i32) -> (i32, i32, i32) {
    %c0_i32 = arith.constant 0 : i32
    %c0_i32_0 = arith.constant 0 : i32
    %c0_i32_1 = arith.constant 0 : i32
    return %arg0, %c0_i32, %c0_i32_0 : i32, i32, i32
  }
}

</mosaic_0001>

<bundles_post_ra>
// kernel: tpu_custom_call.1
= control target key start
LH: loop header
LB: loop body
LE: loop exit
PB: predicated region body
PF: predicated region fallthrough
CT: control target
= control target key end

     0   :  { %s1144_s0 = inlined_call_operand.vmem [shape: f32[2,4,16], index: 0, kind: input, shape index: {}]   ;;  %s1145_s1 = inlined_call_operand.vmem [shape: f32[8,8], index: 1, kind: input, shape index: {}]   ;;  %s1146_s2 = inlined_call_operand.vmem [shape: f32[8,16], index: 2, kind: input, shape index: {}]   ;;  %s1147_s3 = inlined_call_operand.vmem [shape: f32[8,3], index: 3, kind: input, shape index: {}]   ;;  %s1148_s4 = inlined_call_operand.vmem [shape: f32[8,4], index: 4, kind: input, shape index: {}]   ;;  %s1149_s5 = inlined_call_operand.hbm [shape: f32[8,16], index: 5, kind: input, shape index: {}]   ;;  %s1150_s6 = inlined_call_operand.hbm [shape: f32[8,16], index: 6, kind: input, shape index: {}]   ;;  %s1151_s7 = inlined_call_operand.vmem [shape: f32[8,2], index: 7, kind: input, shape index: {}]   ;;  %s1152_s8 = inlined_call_operand.vmem [shape: f32[1,8], index: 8, kind: input, shape index: {}]   ;;  %s1153_s9 = inlined_call_operand.<no memory space> [shape: f32[1,1], index: 9, kind: input, shape index: {}]   ;;  %s1154_s10 = inlined_call_operand.hbm [shape: f32[2,1,16], index: 10, kind: output, shape index: {}]  }
   0x1   :  { %v15_v0 = vstv %s1153_s9 }
   0x2   :  { %16 = vst [vmem:[#allocation2] sm:$0x1] %v15_v0 }
   0x3   :  { %17 = vsyncpa [#allocation4], 0 }
   0x4   :  { %18 = vsyncpa [#allocation7], 0 }
   0x5   :  { %19 = vsyncpa [#allocation5], 0 }
   0x6   :  { %21 = vsyncpa [#allocation5 + $0x1], 0  ;;  %s1009_s15 = smov 0   ;;  %s1011_s16 = smov 0  }
   0x7   :  { %s1013_s17 = smov 0   ;;  %s1015_s18 = smov 0  }
   0x8 LB: > { %s1030_s9 = sadd.s32 4294967295, %s942_s18   ;;  %s712_s19 = sadd.s32 4294967294, %s942_s18   ;;  %s942_s18 = sphi %s1015_s18, %s1161_s18   ;;  %s938_s17 = sphi %s1013_s17, %s1160_s17   ;;  %s934_s16 = sphi %s1011_s16, %s1159_s16   ;;  %s930_s15 = sphi %s1009_s15, %s1158_s15  }
   0x9   : > { %s1034_s20 = sadd.s32 1, %s942_s18   ;;  %s249_s21 = sadd.s32 1, %s938_s17 }
   0xa   : > { %s246_s22 = ssub.s32 %s942_s18, %s1034_s20  ;;  %p259_p0 = scmp.ne.s32.totalorder %s938_s17, %s934_s16 }
   0xb   : > { %p247_p1 = scmp.eq.s32.totalorder %s246_s22, 0  ;;  %p260_p2 = scmp.eq.s32.totalorder %s1030_s9, 1 }
   0xc   : > { %p265_p3 = scmp.ne.s32.totalorder %s934_s16, %s930_s15  ;;  %p266_p4 = scmp.eq.s32.totalorder %s712_s19, 1 }
   0xd   : > { %s1045_s23 = scalar_select %p247_p1, %s938_s17, %s249_s21  }
   0xe   : > { %p1047_p5 = por %p260_p2, %p259_p0  ;;  %p1051_p6 = por %p266_p4, %p265_p3 }
   0xf   : > { %p713_p7 = scmp.ge.s32.totalorder %s942_s18, 1  ;;  %p273_p8 = scmp.lt.s32.totalorder %s942_s18, 3 }
  0x10   : > { %p758_p9 = scmp.eq.s32.totalorder %s1030_s9, 0  ;;  %s297_s29 = sshll.u32 %s1149_s5, 4  ;;  %s298_s29 = int_to_ptr.hbm [resolvable:$true] %s297_s29 }
  0x11   : > { %p1058_p10 = pnand %p713_p7, %p273_p8  ;;  %s944_s30 = smov [#allocation3]  }
  0x12   : > { %s299_s11 = sshll.u32 %s944_s30, 4  ;;  %s309_s14 = sshll.u32 %s1150_s6, 4  ;;  %s300_s11 = int_to_ptr.vmem [resolvable:$true] %s299_s11  ;;  %s310_s14 = int_to_ptr.hbm [resolvable:$true] %s309_s14 }
  0x13   : > { %p747_p11 = pneg %p1058_p10  ;;  %s945_s19 = smov [#allocation6]  }
  0x14   : > { %s311_s21 = sshll.u32 %s945_s19, 4  ;;  %340 = sbr.rel (%p1058_p10) target bundleno = 1153 (0x481), region = 60  ;;  %s312_s21 = int_to_ptr.vmem [resolvable:$true] %s311_s21 }
  0x15   : > { %p748_p12 = pnand %p758_p9, %p747_p11 }
  0x17   : > { %750 = dma.hbm_to_vmem [thread:$0]  (!%p748_p12), %s298_s29, 128, %s300_s11, [#allocation4]  }
  0x18   : > { %753 = dma.hbm_to_vmem [thread:$0]  (!%p748_p12), %s310_s14, 128, %s312_s21, [#allocation7]  }
  0x19   : > { %917 = dma.done.wait (%p758_p9), [#allocation4], 128  }
  0x1a   : > { %919 = vsyncadd (%p758_p9), [#allocation4], 4294967168 }
  0x1b   : > { %921 = dma.done.wait (%p758_p9), [#allocation7], 128  }
  0x1c   : > { %923 = vsyncadd (%p758_p9), [#allocation7], 4294967168  ;;  %p382_p13 = scmp.lt.s32.totalorder %s1030_s9, 1  ;;  %s946_s30 = smov 1   ;;  %vm396_vm0 = vcmask 1043456   ;;  %v387_v2 = vld [vmem:[%s1147_s3] sm:$0xff] }
  0x1d   : > { %v947_v3 = vmov 0   ;;  %vm392_vm1 = vcmask 7168   ;;  %v398_v7 = vld [vmem:[%s1145_s1] sm:$0xff]  ;;  %vm404_vm2 = vcmask 64512   ;;  %vm469_vm3 = vcmask 31744   ;;  %s950_s28 = smov 2   ;;  %s631_s19 = scalar_lea.hbm %s1154_s10, %s1030_s9 }
  0x1e   : > { %s383_s22 = scalar_select %p382_p13, %s1030_s9, 1  ;;  %802 = vset.pattern.permute.xlu0 %v947_v3  ;;  %v464_v9 = vld [vmem:[%s1148_s4] sm:$0xff]  ;;  %v948_v14 = vmov 1   ;;  %v949_v15 = vmov 2   ;;  %vm722_vm4 = vmneg %vm392_vm1  ;;  %vm439_vm5 = vcmask 130048   ;;  %vm502_vm6 = vcmask 15360  }
  0x1f   : > { %803 = vset.pattern.permute.xlu1 %v948_v14  ;;  %804 = vset.pattern.permute.xlu2 %v949_v15  ;;  %v434_v16 = vld [vmem:[%s1146_s2] sm:$0xff]  ;;  %vm727_vm7 = vmneg %vm502_vm6  ;;  %v539_v35 = vld [vmem:[#allocation6] sm:$0xff]  ;;  %s380_s12 = sand.u32 1, %s934_s16   ;;  %vm620_vm11 = vcmask 122880   ;;  %s892_s11 = scalar_lea.hbm %s1154_s10, 2 }
  0x20   : > { %s720_s27 = sshll.u32 %s383_s22, 2  ;;  %466 = vperm.xlu2 %804, %v387_v2   ;;  %v497_v27 = vld [vmem:[%s1151_s7] sm:$0xff]  ;;  %s381_s21 = scalar_lea.vmem [#allocation8], %s380_s12 }
  0x21   : > { %s385_s29 = scalar_lea.vmem %s1144_s0, %s720_s27  ;;  %v571_v28 = vld [vmem:[#allocation2] sm:$0x1]  ;;  %v504_v29 = vld [vmem:[#allocation3] sm:$0xff]  ;;  %s633_s22 = sshll.u32 %s381_s21, 4  ;;  %s634_s22 = int_to_ptr.vmem [resolvable:$true] %s633_s22 }
  0x22   : > { %v386_v1 = vld [vmem:[%s385_s29] sm:$0xf]  ;;  %s635_s27 = sshll.u32 %s631_s19, 4  ;;  %s623_s9 = scalar_lea.sflag [#allocation5], %s380_s12  ;;  %s636_s27 = int_to_ptr.hbm [resolvable:$true] %s635_s27 }
  0x23   : > { %389 = vrot.lane.b32.xlu0 %v386_v1, %s946_s30  ;;  %725 = vmatpush.msk.msra.mxu2 %vm396_vm0, %v386_v1  ;;  %v394_v4 = vrot.slane %v386_v1, 4  ;;  %v570_v43 = vld [vmem:[%s1152_s8] sm:$0x1] }
  0x24   : > { %726 = vmatmul.msk.f32.vlgmr.msra.gmra.mxu2 %vm469_vm3, %v464_v9 }
  0x2b   : > { %401 = vperm.xlu0 %802, %v387_v2  }
  0x33   : > { %806 = vset.pattern.permute.xlu0 %v948_v14 }
  0x34   : > { %541 = vperm.xlu0 %806, %v497_v27  }
  0x3c   : > { %807 = vset.pattern.permute.xlu0 %v947_v3 }
  0x7a   : > { %v467_v19 = vpop.permute.xlu2 %466 }
  0x95   : > { %v390_v5 = vpop.permute.xlu0 %389 }
  0x96   : > { %v393_v6 = vsel %vm392_vm1, 0.0, %v390_v5 }
  0x97   : > { %v397_v8 = vsel %vm396_vm0, %v393_v6, %v394_v4 }
  0x98   : > { %423 = vmatpush.msra.mxu0 %v397_v8 }
  0x99   : > { %721 = vmatmul.msk.f32.vlgmr.msra.gmra.mxu0 %vm404_vm2, %v398_v7 }
  0x9d   : > { %v402_v10 = vpop.permute.xlu0 %401 }
  0xa6   : > { %v542_v37 = vpop.permute.xlu0 %541 }
  0xa7   : > { %v492_v20 = vpop.f32.mrf.mxu2 }
  0xa8   : > { %v493_v23 = vadd.f32 %v492_v20, %v467_v19 }
 0x116   : > { %v425_v11 = vpop.f32.mrf.mxu0 }
 0x117   : > { %v426_v12 = vadd.f32 %v425_v11, %v402_v10 }
 0x119   : > { %v428_v13 = vmax.f32 %v426_v12, 0.0 }
 0x11b   : > { %430 = vrot.lane.b32.xlu1 %v428_v13, %s946_s30  ;;  %457 = vmatpush.msra.mxu1 %v428_v13 }
 0x123   : > { %436 = vperm.xlu1 %803, %v387_v2  }
 0x12b   : > { %805 = vset.pattern.permute.xlu1 %v947_v3 }
 0x12c   : > { %507 = vperm.xlu1 %805, %v497_v27  }
 0x134   : > { %574 = vperm.xlu1 %805, %v571_v28  }
 0x18d   : > { %v431_v17 = vpop.permute.xlu1 %430 }
 0x18e   : > { %723 = vmatpush.msk.msra.mxu1 %vm722_vm4, %v431_v17 }
 0x18f   : > { %724 = vmatmul.msk.f32.vlgmr.msra.gmra.mxu1 %vm439_vm5, %v434_v16 }
 0x195   : > { %v437_v18 = vpop.permute.xlu1 %436 }
 0x19e   : > { %v508_v31 = vpop.permute.xlu1 %507 }
 0x1a6   : > { %v575_v44 = vpop.permute.xlu1 %574 }
 0x1a7   : > { %v577_v45 = vperm.slane %v575_v44, 0 }
 0x20c   : > { %v460_v21 = vpop.f32.mrf.mxu1 }
 0x20d   : > { %v461_v22 = vadd.f32 %v460_v21, %v437_v18 }
 0x20f   : > { %v463_v24 = vmax.f32 %v461_v22, 0.0 }
 0x211   : > { %v495_v25 = vadd.f32 %v493_v23, %v463_v24 }
 0x213   : > { %v496_v26 = vmax.f32 %v495_v25, 0.0 }
 0x215   : > { %499 = vrot.lane.b32.xlu2 %v496_v26, %s950_s28  ;;  %527 = vmatpush.msra.mxu3 %v496_v26 }
 0x26f   : > { %v500_v30 = vpop.permute.xlu2 %499 }
 0x270   : > { %728 = vmatpush.msk.msra.mxu3 %vm727_vm7, %v500_v30 }
 0x271   : > { %729 = vmatmul.msk.f32.vlgmr.msra.gmra.mxu3 %vm439_vm5, %v504_v29 }
 0x2f4   : > { %v530_v32 = vpop.f32.mrf.mxu3 }
 0x2f5   : > { %v531_v33 = vadd.f32 %v530_v32, %v508_v31 }
 0x2f7   : > { %v533_v34 = vmax.f32 %v531_v33, 0.0 }
 0x2f9   : > { %535 = vrot.lane.b32.xlu2 %v533_v34, %s950_s28  ;;  %561 = vmatpush.msrb.mxu0 %v533_v34  ;;  %s886_s28 = sshra.s32 %s636_s27, 4  ;;  %s887_s28 = int_to_ptr.hbm [resolvable:$true] %s886_s28 }
 0x2fa   : > { %s888_s26 = scalar_lea.hbm %s887_s28, 1  ;;  %p893_p3 = scmp.lt.s32.totalorder %s887_s28, %s1154_s10 }
 0x2fb   : > { %p889_p0 = scmp.ne.s32.totalorder %s887_s28, %s888_s26  ;;  %p894_p4 = scmp.lt.s32.totalorder %s892_s11, %s888_s26 }
 0x2fd   : > { %p890_p1 = pnand %p889_p0, %p1047_p5  ;;  %p895_p7 = por %p894_p4, %p893_p3 }
 0x2ff   : > { %p891_p2 = pneg %p890_p1 }
 0x301   : > { %p896_p8 = pnand %p895_p7, %p891_p2 }
 0x353   : > { %v536_v36 = vpop.permute.xlu2 %535 }
 0x354   : > { %731 = vmatpush.msk.msrb.mxu0 %vm727_vm7, %v536_v36 }
 0x355   : > { %732 = vmatmul.msk.f32.vlgmr.msrb.gmra.mxu0 %vm439_vm5, %v539_v35 }
 0x3d2   : > { %v564_v38 = vpop.f32.mrf.mxu0 }
 0x3d3   : > { %v565_v39 = vadd.f32 %v564_v38, %v542_v37 }
 0x3d5   : > { %v567_v40 = vmax.f32 %v565_v39, 0.0 }
 0x3d7   : > { %v568_v41 = vadd.f32 %v567_v40, %v496_v26 }
 0x3d9   : > { %v569_v42 = vmax.f32 %v568_v41, 0.0 }
 0x3db   : > { %596 = vmatpush.msrb.mxu2 %v569_v42 }
 0x3dc   : > { %733 = vmatmul.msk.f32.vlgmr.msrb.gmra.mxu2 %vm404_vm2, %v570_v43 }
 0x45f   : > { %v598_v46 = vpop.f32.mrf.mxu2 }
 0x460   : > { %v599_v47 = vadd.f32 %v598_v46, %v577_v45 }
 0x462   : > { %v734_v48 = vmul.f32 -1.442695, %v599_v47 }
 0x464   : > { %808 = vpow2.f32 %v734_v48 }
 0x46a   : > { %v809_v49 = vpop.eup %808 }
 0x46b   : > { %v604_v50 = vadd.f32 1.0, %v809_v49 }
 0x46d   : > { %810 = vrcp.f32 %v604_v50  ;;  %v616_v54 = vand.u32 2147483648, %v604_v50  ;;  %v614_v56 = vand.u32 2147483647, %v604_v50  ;;  %vm610_vm9 = vweird.f32 %v604_v50 }
 0x46f   : > { %v617_v58 = vor.u32 1.1754944e-38, %v616_v54  ;;  %vm615_vm12 = vcmp.eq.f32.partialorder %v614_v56, 8.507059e+37 }
 0x473   : > { %v811_v51 = vpop.eup %810 }
 0x474   : > { %v606_v52 = vmul.f32 %v811_v51, %v604_v50  ;;  %vm611_vm8 = vweird.f32 %v811_v51 }
 0x475   : > { %vm612_vm10 = vmor %vm610_vm9, %vm611_vm8 }
 0x476   : > { %v607_v53 = vsub.f32 1.0, %v606_v52 }
 0x478   : > { %v608_v55 = vmul.f32 %v811_v51, %v607_v53 }
 0x47a   : > { %v609_v57 = vadd.f32 %v811_v51, %v608_v55 }
 0x47c   : > { %v613_v59 = vsel %vm612_vm10, %v811_v51, %v609_v57 }
 0x47d   : > { %v618_v60 = vsel %vm615_vm12, %v617_v58, %v613_v59 }
 0x47e   : > { %621 = vst.msk [vmem:[%s381_s21] sm:$0x1] %vm620_vm11, %v618_v60 }
 0x47f   : > { %899 = shalt.err (!%p896_p8)
}
 0x480   : > { %745 = dma.vmem_to_hbm [thread:$0]  (%p1047_p5), %s634_s22, 16, %s636_s27, %s623_s9  }
 0x481 PF: > { %p762_p9 = scmp.ge.s32.totalorder %s942_s18, 2  ;;  %s647_s12 = sand.u32 1, %s930_s15  }
 0x482   : > { %s648_s19 = scalar_lea.sflag [#allocation5], %s647_s12 }
 0x483   : > { %p755_p10 = pnand %p762_p9, %p1051_p6 }
 0x485   : > { %p756_p11 = pneg %p755_p10 }
 0x487   : > { %925 = dma.done.wait (%p756_p11), %s648_s19, 16  }
 0x488   : > { %927 = vsyncadd (%p756_p11), %s648_s19, 4294967280  ;;  %p24_p12 = scmp.ge.s32.totalorder %s1034_s20, 4   ;;  %s1158_s15 = smov %s934_s16 }
 0x489   : > { %s1159_s16 = smov %s938_s17  ;;  %s1160_s17 = smov %s1045_s23 }
 0x48a   : > { %s1161_s18 = smov %s1034_s20  ;;  %26 = sbr.rel (!%p24_p12) target bundleno = 8 (0x8), region = 104 }
 0x48f   :  { %653 = vsyncpa [#allocation4], 1 }
 0x490   :  { %655 = vsyncpa [#allocation4 + $0x1], 1 }
 0x491   :  { %656 = vsyncpa [#allocation7], 1 }
 0x492   :  { %657 = vsyncpa [#allocation5], 1 }
 0x493   :  { %659 = vsyncpa [#allocation5 + $0x1], 1 }

</bundles_post_ra>
